<compile_context>
chip_gen: v7x
topology: tpu7x:2x2x1
jax: 0.10.0
libtpu: 0.0.40
codegen_flags: <defaults>
</compile_context>

<pallas_src>
import jax
import jax.numpy as jnp
from jax.experimental import pallas as pl
from jax.experimental.pallas import tpu as pltpu


def _round_up(n, m):
    return ((n + m - 1) // m) * m


def _cdiv(a, b):
    return -(-a // b)


def dqn_kernel(x_ref, w1_ref, b1_ref, w2_ref, b2_ref, w3_ref, b3_ref, o_ref):
    # fc1 + ReLU  (bf16 operands -> f32 accumulate on the MXU)
    h1 = jnp.dot(x_ref[...], w1_ref[...], preferred_element_type=jnp.float32)
    h1 = jnp.maximum(h1 + b1_ref[...], 0.0)
    # fc2 + ReLU
    h2 = jnp.dot(h1.astype(jnp.bfloat16), w2_ref[...],
                 preferred_element_type=jnp.float32)
    h2 = jnp.maximum(h2 + b2_ref[...], 0.0)
    # out head (no activation); lane-padded width -> unmasked stores, bf16 writeback
    o = jnp.dot(h2.astype(jnp.bfloat16), w3_ref[...],
                preferred_element_type=jnp.float32)
    o_ref[...] = (o + b3_ref[...]).astype(o_ref.dtype)


def _xla_forward(x, params):
    """Tiny-batch fast path (plain XLA), numerically matching the kernel."""
    xb = x.astype(jnp.bfloat16)
    h1 = jax.nn.relu(jnp.dot(xb, params["w1"],
                             preferred_element_type=jnp.float32) + params["b1"])
    h2 = jax.nn.relu(jnp.dot(h1.astype(jnp.bfloat16), params["w2"],
                             preferred_element_type=jnp.float32) + params["b2"])
    o = jnp.dot(h2.astype(jnp.bfloat16), params["w3"],
                preferred_element_type=jnp.float32) + params["b3"]
    return o[:, :params["out_dim"]]


def dqn_forward(x, params, *, tm=1024, min_pallas_batch=64):
    """x: [B, input_dim] float32.  Returns [B, output_dim] float32."""
    B, in_dim = x.shape

    # Fast path: for tiny online-inference batches the pallas_call launch cost
    # exceeds the whole network; plain XLA is as fast and avoids padding.
    if B < min_pallas_batch:
        return _xla_forward(x, params)

    w1, b1 = params["w1"], params["b1"]
    w2, b2 = params["w2"], params["b2"]
    w3, b3 = params["w3"], params["b3"]
    out_dim = params["out_dim"]
    h1_dim = w1.shape[1]
    h2_dim = w2.shape[1]
    out_pad = w3.shape[1]  # already padded to a multiple of 128

    # bf16 cast in the wrapper: halves the per-step input DMA.
    xb = x.astype(jnp.bfloat16)

    # Tile selection: as few grid steps as possible (big tiles), but an EVEN
    # number >= 2 so both v7x TensorCores get balanced work, and a tile size
    # that minimizes batch padding (no near-empty last tile).
    b8 = _round_up(B, 8)
    n_tiles = max(_cdiv(b8, tm), 2)
    if n_tiles % 2:
        n_tiles += 1
    tm_eff = _round_up(_cdiv(b8, n_tiles), 8)
    b_pad = tm_eff * n_tiles
    if b_pad != B:
        xb = jnp.pad(xb, ((0, b_pad - B), (0, 0)))

    out_padded = pl.pallas_call(
        dqn_kernel,
        out_shape=jax.ShapeDtypeStruct((b_pad, out_pad), jnp.bfloat16),
        grid_spec=pl.GridSpec(
            grid=(n_tiles,),
            in_specs=[
                # batch-tiled bf16 activation input
                pl.BlockSpec((tm_eff, in_dim), lambda i: (i, 0)),
                # weights / biases: constant block index -> VMEM-resident,
                # fetched once across the whole grid.
                pl.BlockSpec((in_dim, h1_dim), lambda i: (0, 0)),
                pl.BlockSpec((1, h1_dim), lambda i: (0, 0)),
                pl.BlockSpec((h1_dim, h2_dim), lambda i: (0, 0)),
                pl.BlockSpec((1, h2_dim), lambda i: (0, 0)),
                pl.BlockSpec((h2_dim, out_pad), lambda i: (0, 0)),
                pl.BlockSpec((1, out_pad), lambda i: (0, 0)),
            ],
            out_specs=pl.BlockSpec((tm_eff, out_pad), lambda i: (i, 0)),
        ),
        compiler_params=pltpu.CompilerParams(
            dimension_semantics=("parallel",),
            vmem_limit_bytes=32 << 20,  # headroom for large tiles; safe on v5e..v7x
        ),
    )(xb, w1, b1, w2, b2, w3, b3)

    # Upcast and slice away batch / lane padding.
    return out_padded[:B, :out_dim].astype(jnp.float32)


def init_params(key, input_dim, output_dim):
    """PyTorch-like uniform fan-in init.

    Weights stored as [in, out] (transposed vs nn.Linear), cast to bf16.
    Biases stay f32, shape [1, out]. The output head is zero-padded to a
    multiple of 128 lanes; the logical output_dim is recorded for slicing."""
    def linear(key, fan_in, fan_out):
        kw, kb = jax.random.split(key)
        bound = 1.0 / jnp.sqrt(fan_in)
        w = jax.random.uniform(kw, (fan_in, fan_out), jnp.float32, -bound, bound)
        b = jax.random.uniform(kb, (1, fan_out), jnp.float32, -bound, bound)
        return w, b

    k1, k2, k3 = jax.random.split(key, 3)
    w1, b1 = linear(k1, input_dim, 256)
    w2, b2 = linear(k2, 256, 128)
    w3, b3 = linear(k3, 128, output_dim)

    out_pad = _round_up(output_dim, 128)
    w3p = jnp.zeros((128, out_pad), jnp.float32).at[:, :output_dim].set(w3)
    b3p = jnp.zeros((1, out_pad), jnp.float32).at[:, :output_dim].set(b3)

    # NOTE: bf16 weights deviate from an f32 PyTorch DQN by O(1e-3) relative;
    # keep f32 weights here if exact Q-value parity with torch is required.
    return {
        "w1": w1.astype(jnp.bfloat16), "b1": b1,
        "w2": w2.astype(jnp.bfloat16), "b2": b2,
        "w3": w3p.astype(jnp.bfloat16), "b3": b3p,
        "out_dim": output_dim,
    }


def dqn_reference(x, p):
    """Pure-JAX f32 reference using the same (bf16-quantized) weights."""
    w1 = p["w1"].astype(jnp.float32)
    w2 = p["w2"].astype(jnp.float32)
    w3 = p["w3"].astype(jnp.float32)[:, :p["out_dim"]]
    b3 = p["b3"][:, :p["out_dim"]]
    h1 = jax.nn.relu(x @ w1 + p["b1"])
    h2 = jax.nn.relu(h1 @ w2 + p["b2"])
    return h2 @ w3 + b3


if __name__ == "__main__":
    key = jax.random.PRNGKey(0)
    k_params, k_x1, k_x2, k_x3 = jax.random.split(key, 4)

    input_dim = 32    # flattened tetris board features
    output_dim = 8    # number of actions
    params = init_params(k_params, input_dim, output_dim)

    # Case 1: tiny online-inference batch (B=2) -- XLA fast path (no Pallas).
    x_small = jax.random.normal(k_x1, (2, input_dim), jnp.float32)
    out_small = jax.block_until_ready(dqn_forward(x_small, params))
    ref_small = dqn_reference(x_small, params)
    assert out_small.shape == (2, output_dim), out_small.shape
    assert jnp.allclose(out_small, ref_small, atol=2e-2, rtol=2e-2), \
        "small-batch mismatch vs reference"

    # Case 2: awkward mid batch (B=203) -- Pallas path, exercises minimal-padding tiling.
    x_mid = jax.random.normal(k_x2, (203, input_dim), jnp.float32)
    out_mid = jax.block_until_ready(dqn_forward(x_mid, params))
    ref_mid = dqn_reference(x_mid, params)
    assert out_mid.shape == (203, output_dim), out_mid.shape
    assert jnp.allclose(out_mid, ref_mid, atol=2e-2, rtol=2e-2), \
        "mid-batch mismatch vs reference"

    # Case 3: replay-buffer-style batch (B=512) -- Pallas path, 2 parallel grid steps.
    x_big = jax.random.normal(k_x3, (512, input_dim), jnp.float32)
    out_big = jax.block_until_ready(dqn_forward(x_big, params))
    ref_big = dqn_reference(x_big, params)
    assert out_big.shape == (512, output_dim), out_big.shape
    assert jnp.allclose(out_big, ref_big, atol=2e-2, rtol=2e-2), \
        "batched mismatch vs reference"

    print("KERNEL_OK")
</pallas_src>

<mosaic_0001>
module attributes {stable_mosaic.version = 11 : i64} {
  func.func @dqn_kernel(%arg0: i32, %arg1: memref<104x32xbf16, #tpu.memory_space<vmem>>, %arg2: memref<32x256xbf16, #tpu.memory_space<vmem>>, %arg3: memref<1x256xf32, #tpu.memory_space<vmem>>, %arg4: memref<256x128xbf16, #tpu.memory_space<vmem>>, %arg5: memref<1x128xf32, #tpu.memory_space<vmem>>, %arg6: memref<128x128xbf16, #tpu.memory_space<vmem>>, %arg7: memref<1x128xf32, #tpu.memory_space<vmem>>, %arg8: memref<104x128xbf16, #tpu.memory_space<vmem>>) attributes {dimension_semantics = [#tpu.dimension_semantics<parallel>], iteration_bounds = array<i64: 2>, scalar_prefetch = 0 : i64, scratch_operands = 0 : i64, tpu.core_type = #tpu.core_type<tc>, window_params = [{transform_indices = @transform_0, window_bounds = array<i64: 104, 32>}, {pipeline_mode = #tpu.pipeline_mode<synchronous>, transform_indices = @transform_1, window_bounds = array<i64: 32, 256>}, {pipeline_mode = #tpu.pipeline_mode<synchronous>, transform_indices = @transform_2, window_bounds = array<i64: 1, 256>}, {pipeline_mode = #tpu.pipeline_mode<synchronous>, transform_indices = @transform_3, window_bounds = array<i64: 256, 128>}, {pipeline_mode = #tpu.pipeline_mode<synchronous>, transform_indices = @transform_4, window_bounds = array<i64: 1, 128>}, {pipeline_mode = #tpu.pipeline_mode<synchronous>, transform_indices = @transform_5, window_bounds = array<i64: 128, 128>}, {pipeline_mode = #tpu.pipeline_mode<synchronous>, transform_indices = @transform_6, window_bounds = array<i64: 1, 128>}, {transform_indices = @transform_7, window_bounds = array<i64: 104, 128>}]} {
    %c0 = arith.constant 0 : index
    %c0_0 = arith.constant 0 : index
    %0 = vector.load %arg1[%c0, %c0_0] : memref<104x32xbf16, #tpu.memory_space<vmem>>, vector<104x32xbf16>
    %c0_1 = arith.constant 0 : index
    %c0_2 = arith.constant 0 : index
    %1 = vector.load %arg2[%c0_1, %c0_2] : memref<32x256xbf16, #tpu.memory_space<vmem>>, vector<32x256xbf16>
    %cst = arith.constant dense<0.000000e+00> : vector<104x256xf32>
    %2 = tpu.matmul %0, %1, %cst {dimension_numbers = #tpu.dot_dimension_numbers<[1], [0], [0], [1], [0, 0, 1, 1], [], []>} : vector<104x32xbf16>, vector<32x256xbf16>, vector<104x256xf32> -> vector<104x256xf32>
    %c0_3 = arith.constant 0 : index
    %c0_4 = arith.constant 0 : index
    %3 = vector.load %arg3[%c0_3, %c0_4] : memref<1x256xf32, #tpu.memory_space<vmem>>, vector<1x256xf32>
    %4 = vector.broadcast %3 : vector<1x256xf32> to vector<104x256xf32>
    %5 = arith.addf %2, %4 : vector<104x256xf32>
    %cst_5 = arith.constant 0.000000e+00 : f32
    %6 = vector.broadcast %cst_5 : f32 to vector<104x256xf32>
    %7 = arith.maximumf %5, %6 : vector<104x256xf32>
    %8 = arith.truncf %7 : vector<104x256xf32> to vector<104x256xbf16>
    %c0_6 = arith.constant 0 : index
    %c0_7 = arith.constant 0 : index
    %9 = vector.load %arg4[%c0_6, %c0_7] : memref<256x128xbf16, #tpu.memory_space<vmem>>, vector<256x128xbf16>
    %cst_8 = arith.constant dense<0.000000e+00> : vector<104x128xf32>
    %10 = tpu.matmul %8, %9, %cst_8 {dimension_numbers = #tpu.dot_dimension_numbers<[1], [0], [0], [1], [0, 0, 1, 1], [], []>} : vector<104x256xbf16>, vector<256x128xbf16>, vector<104x128xf32> -> vector<104x128xf32>
    %c0_9 = arith.constant 0 : index
    %c0_10 = arith.constant 0 : index
    %11 = vector.load %arg5[%c0_9, %c0_10] : memref<1x128xf32, #tpu.memory_space<vmem>>, vector<1x128xf32>
    %12 = vector.broadcast %11 : vector<1x128xf32> to vector<104x128xf32>
    %13 = arith.addf %10, %12 : vector<104x128xf32>
    %cst_11 = arith.constant 0.000000e+00 : f32
    %14 = vector.broadcast %cst_11 : f32 to vector<104x128xf32>
    %15 = arith.maximumf %13, %14 : vector<104x128xf32>
    %16 = arith.truncf %15 : vector<104x128xf32> to vector<104x128xbf16>
    %c0_12 = arith.constant 0 : index
    %c0_13 = arith.constant 0 : index
    %17 = vector.load %arg6[%c0_12, %c0_13] : memref<128x128xbf16, #tpu.memory_space<vmem>>, vector<128x128xbf16>
    %cst_14 = arith.constant dense<0.000000e+00> : vector<104x128xf32>
    %18 = tpu.matmul %16, %17, %cst_14 {dimension_numbers = #tpu.dot_dimension_numbers<[1], [0], [0], [1], [0, 0, 1, 1], [], []>} : vector<104x128xbf16>, vector<128x128xbf16>, vector<104x128xf32> -> vector<104x128xf32>
    %c0_15 = arith.constant 0 : index
    %c0_16 = arith.constant 0 : index
    %19 = vector.load %arg7[%c0_15, %c0_16] : memref<1x128xf32, #tpu.memory_space<vmem>>, vector<1x128xf32>
    %20 = vector.broadcast %19 : vector<1x128xf32> to vector<104x128xf32>
    %21 = arith.addf %18, %20 : vector<104x128xf32>
    %22 = arith.truncf %21 : vector<104x128xf32> to vector<104x128xbf16>
    %c0_17 = arith.constant 0 : index
    %c0_18 = arith.constant 0 : index
    %23 = vector.load %arg8[%c0_17, %c0_18] : memref<104x128xbf16, #tpu.memory_space<vmem>>, vector<104x128xbf16>
    tpu.vector_store %arg8[%c0_17, %c0_18], %22 {strides = array<i32>} : memref<104x128xbf16, #tpu.memory_space<vmem>>, vector<104x128xbf16>,
    return
  }
  func.func @transform_0(%arg0: i32) -> (i32, i32) {
    %c0_i32 = arith.constant 0 : i32
    %c0_i32_0 = arith.constant 0 : i32
    return %arg0, %c0_i32 : i32, i32
  }
  func.func @transform_1(%arg0: i32) -> (i32, i32) {
    %c0_i32 = arith.constant 0 : i32
    %c0_i32_0 = arith.constant 0 : i32
    %c0_i32_1 = arith.constant 0 : i32
    return %c0_i32, %c0_i32_0 : i32, i32
  }
  func.func @transform_2(%arg0: i32) -> (i32, i32) {
    %c0_i32 = arith.constant 0 : i32
    %c0_i32_0 = arith.constant 0 : i32
    %c0_i32_1 = arith.constant 0 : i32
    return %c0_i32, %c0_i32_0 : i32, i32
  }
  func.func @transform_3(%arg0: i32) -> (i32, i32) {
    %c0_i32 = arith.constant 0 : i32
    %c0_i32_0 = arith.constant 0 : i32
    %c0_i32_1 = arith.constant 0 : i32
    return %c0_i32, %c0_i32_0 : i32, i32
  }
  func.func @transform_4(%arg0: i32) -> (i32, i32) {
    %c0_i32 = arith.constant 0 : i32
    %c0_i32_0 = arith.constant 0 : i32
    %c0_i32_1 = arith.constant 0 : i32
    return %c0_i32, %c0_i32_0 : i32, i32
  }
  func.func @transform_5(%arg0: i32) -> (i32, i32) {
    %c0_i32 = arith.constant 0 : i32
    %c0_i32_0 = arith.constant 0 : i32
    %c0_i32_1 = arith.constant 0 : i32
    return %c0_i32, %c0_i32_0 : i32, i32
  }
  func.func @transform_6(%arg0: i32) -> (i32, i32) {
    %c0_i32 = arith.constant 0 : i32
    %c0_i32_0 = arith.constant 0 : i32
    %c0_i32_1 = arith.constant 0 : i32
    return %c0_i32, %c0_i32_0 : i32, i32
  }
  func.func @transform_7(%arg0: i32) -> (i32, i32) {
    %c0_i32 = arith.constant 0 : i32
    %c0_i32_0 = arith.constant 0 : i32
    return %arg0, %c0_i32 : i32, i32
  }
}

</mosaic_0001>

<bundles_post_ra>
// kernel: tpu_custom_call.1
= control target key start
LH: loop header
LB: loop body
LE: loop exit
PB: predicated region body
PF: predicated region fallthrough
CT: control target
= control target key end

     0   :  { %12 = vsyncpa [#allocation3], 0  ;;  %s1982_s0 = inlined_call_operand.vmem [shape: bf16[208,32], index: 0, kind: input, shape index: {}]   ;;  %s1983_s1 = inlined_call_operand.hbm [shape: bf16[32,256], index: 1, kind: input, shape index: {}]   ;;  %s1984_s2 = inlined_call_operand.vmem [shape: f32[1,256], index: 2, kind: input, shape index: {}]   ;;  %s1985_s3 = inlined_call_operand.vmem [shape: bf16[256,128], index: 3, kind: input, shape index: {}]   ;;  %s1986_s4 = inlined_call_operand.vmem [shape: f32[1,128], index: 4, kind: input, shape index: {}]   ;;  %s1987_s5 = inlined_call_operand.hbm [shape: bf16[128,128], index: 5, kind: input, shape index: {}]   ;;  %s1988_s6 = inlined_call_operand.vmem [shape: f32[1,128], index: 6, kind: input, shape index: {}]   ;;  %s1989_s7 = inlined_call_operand.hbm [shape: bf16[208,128], index: 7, kind: output, shape index: {}]  }
   0x1   :  { %13 = vsyncpa [#allocation6], 0 }
   0x2   :  { %14 = vsyncpa [#allocation4], 0 }
   0x3   :  { %16 = vsyncpa [#allocation4 + $0x1], 0  ;;  %s1648_s24 = smov 0   ;;  %s1650_s25 = smov 0  }
   0x4   :  { %s1652_s26 = smov 0   ;;  %s1654_s27 = smov 0  }
   0x5 LB: > { %s1669_s28 = sadd.s32 4294967295, %s1594_s27   ;;  %s1122_s29 = sadd.s32 4294967294, %s1594_s27   ;;  %s1594_s27 = sphi %s1654_s27, %s2009_s27   ;;  %s1590_s26 = sphi %s1652_s26, %s2008_s26   ;;  %s1586_s25 = sphi %s1650_s25, %s2007_s25   ;;  %s1582_s24 = sphi %s1648_s24, %s2006_s24  }
   0x6   : > { %s1673_s30 = sadd.s32 1, %s1594_s27   ;;  %s181_s8 = sadd.s32 1, %s1590_s26 }
   0x7   : > { %s178_s9 = ssub.s32 %s1594_s27, %s1673_s30  ;;  %p191_p0 = scmp.ne.s32.totalorder %s1590_s26, %s1586_s25 }
   0x8   : > { %p179_p1 = scmp.eq.s32.totalorder %s178_s9, 0  ;;  %p192_p2 = scmp.eq.s32.totalorder %s1669_s28, 1 }
   0x9   : > { %p197_p3 = scmp.ne.s32.totalorder %s1586_s25, %s1582_s24  ;;  %p198_p4 = scmp.eq.s32.totalorder %s1122_s29, 1 }
   0xa   : > { %s1684_s10 = scalar_select %p179_p1, %s1590_s26, %s181_s8  }
   0xb   : > { %p1686_p5 = por %p192_p2, %p191_p0  ;;  %p1690_p6 = por %p198_p4, %p197_p3 }
   0xc   : > { %1993 = sst [smem:[#allocation11_spill]] %s1684_s10  ;;  %p1123_p7 = scmp.ge.s32.totalorder %s1594_s27, 1 }
   0xd   : > { %s1994_s11 = scalar_select %p1686_p5, 1, 0 }
   0xe   : > { %s1995_s12 = scalar_select %p1690_p6, 1, 0 }
   0xf   : > { %p205_p8 = scmp.lt.s32.totalorder %s1594_s27, 3  ;;  %p1990_p9 = scmp.eq.s32.totalorder %s1669_s28, 0 }
  0x10   : > { %s1596_s14 = smov [#allocation2]   ;;  %s1597_s17 = smov [#allocation5]  }
  0x11   : > { %p1697_p10 = pnand %p1123_p7, %p205_p8  ;;  %s217_s15 = sshll.u32 %s1596_s14, 4  ;;  %s218_s15 = int_to_ptr.vmem [resolvable:$true] %s217_s15 }
  0x12   : > { %s239_s18 = sshll.u32 %s1597_s17, 4  ;;  %s1468_s21 = scalar_lea.hbm %s1983_s1, 512  ;;  %s1709_s18 = int_to_ptr.vmem [resolvable:$true] %s239_s18 }
  0x13   : > { %s1996_s13 = scalar_select %p1697_p10, 1, 0 }
  0x14   : > { %p1372_p11 = pneg %p1697_p10  ;;  %p1469_p13 = scmp.ne.s32.totalorder %s1983_s1, %s1468_s21 }
  0x15   : > { %p1475_p3 = scmp.lt.u32.totalorder %s1468_s21, %s1983_s1 }
  0x16   : > { %p1705_p12 = pnand %p1990_p9, %p1372_p11 }
  0x18   : > { %p1470_p0 = pneg %p1705_p12 }
  0x1a   : > { %p1471_p1 = pnand %p1470_p0, %p1469_p13 }
  0x1c   : > { %p1472_p2 = pneg %p1471_p1 }
  0x1e   : > { %p1477_p4 = pnand %p1475_p3, %p1472_p2 }
  0x20   : > { %1480 = shalt.err (!%p1477_p4)
}
  0x21   : > { %s1481_s9 = scalar_lea.vmem %s218_s15, 512  ;;  %p1489_p9 = scmp.lt.s32.totalorder %s218_s15, %s218_s15 }
  0x22   : > { %p1482_p7 = scmp.ne.s32.totalorder %s218_s15, %s1481_s9  ;;  %p1490_p6 = scmp.lt.s32.totalorder %s1481_s9, %s1481_s9 }
  0x24   : > { %p1484_p8 = pnand %p1482_p7, %p1470_p0  ;;  %p1491_p5 = por %p1490_p6, %p1489_p9 }
  0x26   : > { %p1485_p11 = pneg %p1484_p8 }
  0x28   : > { %p1492_p10 = pnand %p1491_p5, %p1485_p11 }
  0x2a   : > { %1495 = shalt.err (!%p1492_p10)
}
  0x2b   : > { %s1598_s14 = smov 128   ;;  %s1599_s17 = smov 8  }
  0x2c   : > { %1375 = dma.hbm_to_vmem [thread:$0]  (!%p1705_p12), %s1983_s1, 512, %s218_s15, [#allocation3], %s1598_s14, %s1598_s14, %s1599_s17  }
  0x2d   : > { %s1496_s23 = scalar_lea.hbm %s1987_s5, 1024 }
  0x2e   : > { %p1497_p13 = scmp.ne.s32.totalorder %s1987_s5, %s1496_s23  ;;  %p1503_p9 = scmp.lt.u32.totalorder %s1496_s23, %s1987_s5 }
  0x30   : > { %p1499_p5 = pnand %p1497_p13, %p1470_p0 }
  0x32   : > { %p1500_p6 = pneg %p1499_p5 }
  0x34   : > { %p1505_p10 = pnand %p1503_p9, %p1500_p6 }
  0x36   : > { %1508 = shalt.err (!%p1505_p10)
}
  0x37   : > { %s1509_s15 = scalar_lea.vmem %s1709_s18, 1024  ;;  %p1517_p4 = scmp.lt.s32.totalorder %s1709_s18, %s1709_s18 }
  0x38   : > { %p1510_p1 = scmp.ne.s32.totalorder %s1709_s18, %s1509_s15  ;;  %p1518_p7 = scmp.lt.s32.totalorder %s1509_s15, %s1509_s15 }
  0x3a   : > { %p1512_p2 = pnand %p1510_p1, %p1470_p0  ;;  %p1519_p8 = por %p1518_p7, %p1517_p4 }
  0x3c   : > { %p1513_p3 = pneg %p1512_p2 }
  0x3e   : > { %p1520_p11 = pnand %p1519_p8, %p1513_p3 }
  0x40   : > { %1523 = shalt.err (!%p1520_p11)
}
  0x41   : > { %s1600_s10 = smov 64   ;;  %s1601_s14 = smov 4  }
  0x42   : > { %1378 = dma.hbm_to_vmem [thread:$0]  (!%p1705_p12), %s1987_s5, 1024, %s1709_s18, [#allocation6], %s1600_s10, %s1600_s10, %s1601_s14  }
  0x43   : > { %p1998_p13 = scmp.ne.s32.totalorder %s1996_s13, 0 }
  0x44   : > { %p1999_p0 = scmp.eq.s32.totalorder (!%p1998_p13), %s1669_s28, 0 }
  0x45   : > { %267 = sbr.rel (%p1998_p13) target bundleno = 814 (0x32e), region = 48 }
  0x4c   : > { %1569 = dma.done.wait (%p1999_p0), [#allocation3], 512   ;;  %p2000_p5 = pmov %p1999_p0 }
  0x4d   : > { %p2001_p6 = pmov %p1999_p0 }
  0x4e   : > { %1571 = vsyncadd (%p2000_p5), [#allocation3], 4294966784 }
  0x4f   : > { %1573 = dma.done.wait (%p2001_p6), [#allocation6], 1024   ;;  %p2002_p9 = pmov %p1999_p0 }
  0x50   : > { %s303_s16 = smul.u32 13, %s1669_s28  ;;  %v1602_v0 = vmov 0   ;;  %v1431_v1 = vld [vmem:[#allocation2 + $0x4] ss:$8 sps:$4 sm:$0xff]   ;;  %v1433_v2 = vld [vmem:[#allocation2] ss:$8 sps:$4 sm:$0xff]   ;;  %v330_v34 = vlaneseq }
  0x51   : > { %1575 = vsyncadd (%p2002_p9), [#allocation6], 4294966272  ;;  %447 = vmatprep.mubr.bf16.mxu0 %v1602_v0  ;;  %487 = vmatprep.mubr.bf16.mxu1 %v1602_v0  ;;  %v1434_v3 = vld [vmem:[#allocation2 + $0x14] ss:$8 sps:$4 sm:$0xff]   ;;  %v1436_v4 = vld [vmem:[#allocation2 + $0x10] ss:$8 sps:$4 sm:$0xff]  }
  0x52   : > { %p304_p12 = scmp.lt.s32.totalorder %s303_s16, 25  ;;  %415 = vmatprep.subr.bf16.mxu0 %v1431_v1  ;;  %1357 = vmatprep.subr.bf16.mxu1 %v1431_v1  ;;  %vm393_vm0 = vcmask 261120   ;;  %v1444_v7 = vld [vmem:[%s1985_s3 + $0x40] sm:$0xff]   ;;  %v1446_v10 = vld [vmem:[%s1985_s3 + $0x48] sm:$0xff]   ;;  %v1448_v13 = vld [vmem:[%s1985_s3 + $0x50] sm:$0xff]   ;;  %v1603_v29 = vmov 0.0  }
  0x53   : > { %416 = vmatpush1.bf16.msra.mxu0 %v1433_v2  ;;  %1359 = vmatpush1.bf16.msra.mxu1 %v1433_v2  ;;  %v1445_v8 = vld [vmem:[%s1985_s3] sm:$0xff]   ;;  %v1447_v11 = vld [vmem:[%s1985_s3 + $0x8] sm:$0xff]   ;;  %v1449_v14 = vld [vmem:[%s1985_s3 + $0x10] sm:$0xff]   ;;  %v331_v35 = vshrl.u32 %v330_v34, 7  ;;  %vm1604_vm1 = vmmov 0   ;;  %s300_s14 = sand.u32 1, %s1586_s25  }
  0x54   : > { %s2011_s16 = smov (!%p304_p12, %s303_s16), 25  ;;  %417 = vmatprep.subr.bf16.mxu0 %v1434_v3  ;;  %1358 = vmatprep.subr.bf16.mxu1 %v1434_v3  ;;  %v1450_v15 = vld [vmem:[%s1985_s3 + $0x58] sm:$0xff]   ;;  %v1452_v19 = vld [vmem:[%s1985_s3 + $0x60] sm:$0xff]   ;;  %v1454_v21 = vld [vmem:[%s1985_s3 + $0x68] sm:$0xff]   ;;  %s1204_s18 = smul.u32 832, %s1669_s28 }
  0x55   : > { %s1130_s13 = sshll.u32 %s2011_s16, 2  ;;  %v1451_v18 = vld [vmem:[%s1985_s3 + $0x18] sm:$0xff]   ;;  %v1453_v20 = vld [vmem:[%s1985_s3 + $0x20] sm:$0xff]   ;;  %v1455_v23 = vld [vmem:[%s1985_s3 + $0x28] sm:$0xff]   ;;  %v332_v36 = vsub.s32 0, %v331_v35  ;;  %v336_v38 = vsub.s32 1, %v331_v35 }
  0x56   : > { %s1772_s21 = scalar_lea.vmem %s1982_s0, %s1130_s13  ;;  %v1456_v24 = vld [vmem:[%s1985_s3 + $0x70] sm:$0xff]   ;;  %v1458_v26 = vld [vmem:[%s1985_s3 + $0x78] sm:$0xff]   ;;  %v1460_v28 = vld [vmem:[#allocation5] sm:$0xff]   ;;  %s1361_s16 = smul.u32 52, %s300_s14 }
  0x57   : > { %v1437_v5 = vld [vmem:[%s1772_s21] sm:$0xff]   ;;  %418 = vmatpush1.bf16.msra.mxu0 %v1436_v4  ;;  %1360 = vmatpush1.bf16.msra.mxu1 %v1436_v4  ;;  %v1438_v9 = vld [vmem:[%s1772_s21 + $0x8] sm:$0xff]   ;;  %v1439_v16 = vld [vmem:[%s1772_s21 + $0x10] sm:$0xff]   ;;  %s1936_s23 = scalar_lea.hbm %s1989_s7, %s1204_s18  ;;  %s1941_s28 = scalar_lea.sflag [#allocation4], %s300_s14 }
  0x58   : > { %v1441_v6 = vld [vmem:[%s1772_s21 + $0x20] sm:$0xff]   ;;  %1240 = vmatprep.subr.bf16.mxu1 %v1444_v7  ;;  %v1442_v12 = vld [vmem:[%s1772_s21 + $0x28] sm:$0xff]   ;;  %v1443_v17 = vld [vmem:[%s1772_s21 + $0x30] ss:$0 sps:$4 sm:$0xff]   ;;  %1313 = vmatprep.subr.bf16.mxu0 %v1603_v29  ;;  %s1921_s13 = scalar_lea.vmem [#allocation7], %s1361_s16  ;;  %p2003_p1 = scmp.ne.s32.totalorder %s1994_s11, 0 }
  0x59   : > { %v1440_v22 = vld [vmem:[%s1772_s21 + $0x18] sm:$0xff]   ;;  %v1457_v25 = vld [vmem:[%s1985_s3 + $0x30] sm:$0xff]   ;;  %v1461_v30 = vld [vmem:[#allocation5 + $0x8] sm:$0xff]   ;;  %s1038_s20 = sshll.u32 %s1921_s13, 4  ;;  %s1605_s8 = smov [#allocation7]   ;;  %s1931_s20 = int_to_ptr.vmem [resolvable:$true] %s1038_s20 }
  0x5a   : > { %1142 = vmatmul.mubr.msk.bf16.vlgmr.msra.gmra.mrb[0].mxu0 %vm393_vm0, %v1437_v5  ;;  %1146 = vmatmul.mubr.msk.bf16.vlgmr.msra.gmra.mrb[0].mxu1 %vm393_vm0, %v1441_v6  ;;  %v1459_v27 = vld [vmem:[%s1985_s3 + $0x38] sm:$0xff]   ;;  %v1462_v31 = vld [vmem:[#allocation5 + $0x10] sm:$0xff]   ;;  %v1464_v33 = vld [vmem:[#allocation5 + $0x20] sm:$0xff]   ;;  %s1524_s29 = scalar_lea.vmem %s1931_s20, 832  ;;  %s1528_s9 = sshll.u32 %s1605_s8, 4  ;;  %s1529_s9 = int_to_ptr.vmem [resolvable:$false] %s1528_s9 }
  0x5b   : > { %457 = vmatprep.mubr.bf16.mxu0 %v1602_v0  ;;  %497 = vmatprep.mubr.bf16.mxu1 %v1602_v0  ;;  %v1463_v32 = vld [vmem:[#allocation5 + $0x18] sm:$0xff]   ;;  %v328_v37 = vld [vmem:[%s1984_s2] sm:$0x3]  ;;  %p1525_p10 = scmp.ne.s32.totalorder %s1931_s20, %s1524_s29  ;;  %s1530_s15 = scalar_lea.vmem %s1529_s9, 1664 }
  0x5c   : > { %1241 = vmatpush3.bf16.msra.mxu1 %v1445_v8  ;;  %1314 = vmatpush3.bf16.msra.mxu0 %v1460_v28  ;;  %v1845_v39 = vrot.slane %v328_v37, %v332_v36  ;;  %v1847_v40 = vrot.slane %v328_v37, %v336_v38  ;;  %p1531_p4 = scmp.lt.s32.totalorder %s1931_s20, %s1529_s9  ;;  %p1532_p7 = scmp.lt.s32.totalorder %s1530_s15, %s1524_s29 }
  0x5d   : > { %1242 = vmatprep.subr.bf16.mxu1 %v1446_v10  ;;  %1315 = vmatprep.subr.bf16.mxu0 %v1603_v29  ;;  %p1526_p2 = pnand %p1525_p10, %p2003_p1 }
  0x5e   : > { %p1533_p8 = por %p1532_p7, %p1531_p4 }
  0x5f   : > { %p1527_p3 = pneg %p1526_p2 }
  0x60   : > { %1243 = vmatpush3.bf16.msra.mxu1 %v1447_v11  ;;  %1316 = vmatpush3.bf16.msra.mxu0 %v1461_v30 }
  0x61   : > { %1244 = vmatprep.subr.bf16.mxu1 %v1448_v13  ;;  %1317 = vmatprep.subr.bf16.mxu0 %v1603_v29  ;;  %p1534_p11 = pnand %p1533_p8, %p1527_p3 }
  0x62   : > { %1143 = vmatmul.mubr.msk.bf16.gmra.mrb[4].mxu0 %vm393_vm0, %v1438_v9  ;;  %1147 = vmatmul.mubr.msk.bf16.gmra.mrb[4].mxu1 %vm393_vm0, %v1442_v12 }
  0x63   : > { %467 = vmatprep.mubr.bf16.mxu0 %v1602_v0  ;;  %507 = vmatprep.mubr.bf16.mxu1 %v1602_v0 }
  0x64   : > { %1245 = vmatpush3.bf16.msra.mxu1 %v1449_v14  ;;  %1318 = vmatpush3.bf16.msra.mxu0 %v1462_v31 }
  0x65   : > { %1246 = vmatprep.subr.bf16.mxu1 %v1450_v15  ;;  %1319 = vmatprep.subr.bf16.mxu0 %v1603_v29 }
  0x68   : > { %1247 = vmatpush3.bf16.msra.mxu1 %v1451_v18  ;;  %1320 = vmatpush3.bf16.msra.mxu0 %v1463_v32 }
  0x69   : > { %1248 = vmatprep.subr.bf16.mxu1 %v1452_v19  ;;  %1321 = vmatprep.subr.bf16.mxu0 %v1603_v29 }
  0x6a   : > { %1144 = vmatmul.mubr.msk.bf16.gmra.mrb[8].mxu0 %vm393_vm0, %v1439_v16  ;;  %1148 = vmatmul.mubr.msk.bf16.gmra.mrb[8].mxu1 %vm393_vm0, %v1443_v17 }
  0x6b   : > { %477 = vmatprep.mubr.bf16.mxu0 %v1602_v0 }
  0x6c   : > { %1249 = vmatpush3.bf16.msra.mxu1 %v1453_v20  ;;  %1322 = vmatpush3.bf16.msra.mxu0 %v1464_v33 }
  0x6d   : > { %1250 = vmatprep.subr.bf16.mxu1 %v1454_v21  ;;  %1323 = vmatprep.subr.bf16.mxu0 %v1603_v29 }
  0x70   : > { %1251 = vmatpush3.bf16.msra.mxu1 %v1455_v23 }
  0x71   : > { %1252 = vmatprep.subr.bf16.mxu1 %v1456_v24 }
  0x72   : > { %1145 = vmatmul.mubr.msk.bf16.gmra.mrb[12].mxu0 %vm393_vm0, %v1440_v22 }
  0x73   : > { %1329 = vmatprep.mubr.msk.bf16.mxu0 %vm1604_vm1, %v1603_v29 }
  0x74   : > { %1253 = vmatpush3.bf16.msra.mxu1 %v1457_v25 }
  0x75   : > { %1254 = vmatprep.subr.bf16.mxu1 %v1458_v26 }
  0x78   : > { %1255 = vmatpush3.bf16.msra.mxu1 %v1459_v27 }
 0x12d   : > { %v449_v41 = vpop.f32.mrb[0].mxu0  ;;  %v489_v42 = vpop.f32.mrb[0].mxu1 }
 0x12e   : > { %v450_v43 = vadd.f32 %v449_v41, %v1845_v39  ;;  %v451_v44 = vpop.f32.mrb[1].mxu0  ;;  %v490_v45 = vadd.f32 %v489_v42, %v1845_v39  ;;  %v491_v46 = vpop.f32.mrb[1].mxu1 }
 0x12f   : > { %v452_v47 = vadd.f32 %v451_v44, %v1847_v40  ;;  %v453_v48 = vpop.f32.mrb[2].mxu0  ;;  %v492_v49 = vadd.f32 %v491_v46, %v1847_v40  ;;  %v493_v50 = vpop.f32.mrb[2].mxu1 }
 0x130   : > { %v454_v51 = vadd.f32 %v453_v48, %v1845_v39  ;;  %v455_v52 = vpop.f32.mrb[3].mxu0  ;;  %v532_v53 = vmax.f32 %v490_v45, 0.0  ;;  %v494_v54 = vadd.f32 %v493_v50, %v1845_v39  ;;  %v495_v55 = vpop.f32.mrb[3].mxu1  ;;  %v516_v59 = vmax.f32 %v450_v43, 0.0 }
 0x131   : > { %v456_v56 = vadd.f32 %v455_v52, %v1847_v40  ;;  %v533_v57 = vmax.f32 %v492_v49, 0.0  ;;  %v496_v58 = vadd.f32 %v495_v55, %v1847_v40  ;;  %v517_v62 = vmax.f32 %v452_v47, 0.0 }
 0x132   : > { %v518_v60 = vmax.f32 %v454_v51, 0.0  ;;  %v534_v61 = vmax.f32 %v494_v54, 0.0 }
 0x133   : > { %v519_v63 = vmax.f32 %v456_v56, 0.0  ;;  %v535_v0 = vmax.f32 %v496_v58, 0.0 }
 0x134   : > { %v542_v1 = vpack.c.bf16 %v518_v60, %v516_v59  ;;  %v1857_v2 = vpack.c.bf16 %v534_v61, %v532_v53 }
 0x135   : > { %v543_v3 = vpack.c.bf16 %v519_v63, %v517_v62  ;;  %v459_v4 = vpop.f32.mrb[4].mxu0  ;;  %v1859_v5 = vpack.c.bf16 %v535_v0, %v533_v57  ;;  %v499_v6 = vpop.f32.mrb[4].mxu1 }
 0x136   : > { %v460_v7 = vadd.f32 %v459_v4, %v1845_v39  ;;  %v461_v8 = vpop.f32.mrb[5].mxu0  ;;  %v500_v9 = vadd.f32 %v499_v6, %v1845_v39  ;;  %v501_v10 = vpop.f32.mrb[5].mxu1 }
 0x137   : > { %v462_v11 = vadd.f32 %v461_v8, %v1847_v40  ;;  %v463_v12 = vpop.f32.mrb[6].mxu0  ;;  %723 = vmatprep.mubr.bf16.mxu1 %v543_v3  ;;  %v502_v13 = vadd.f32 %v501_v10, %v1847_v40  ;;  %v503_v14 = vpop.f32.mrb[6].mxu1 }
 0x138   : > { %v464_v15 = vadd.f32 %v463_v12, %v1845_v39  ;;  %v465_v16 = vpop.f32.mrb[7].mxu0  ;;  %724 = vmatmul.mubr.bf16.vlgmr.msra.gmra.mrb[12].mxu1 %v542_v1  ;;  %v536_v17 = vmax.f32 %v500_v9, 0.0  ;;  %v504_v18 = vadd.f32 %v503_v14, %v1845_v39  ;;  %v505_v19 = vpop.f32.mrb[7].mxu1  ;;  %v520_v23 = vmax.f32 %v460_v7, 0.0  ;;  %v1465_v12 = vld [vmem:[#allocation5 + $0x28] sm:$0xff]  }
 0x139   : > { %v466_v20 = vadd.f32 %v465_v16, %v1847_v40  ;;  %v537_v21 = vmax.f32 %v502_v13, 0.0  ;;  %v506_v22 = vadd.f32 %v505_v19, %v1847_v40  ;;  %v521_v26 = vmax.f32 %v462_v11, 0.0  ;;  %1324 = vmatpush3.bf16.msra.mxu0 %v1465_v12  ;;  %v1466_v13 = vld [vmem:[#allocation5 + $0x30] sm:$0xff]  }
 0x13a   : > { %v522_v24 = vmax.f32 %v464_v15, 0.0  ;;  %v538_v25 = vmax.f32 %v504_v18, 0.0  ;;  %1325 = vmatprep.subr.bf16.mxu0 %v1603_v29 }
 0x13b   : > { %v523_v27 = vmax.f32 %v466_v20, 0.0  ;;  %v539_v28 = vmax.f32 %v506_v22, 0.0 }
 0x13c   : > { %v544_v30 = vpack.c.bf16 %v522_v24, %v520_v23  ;;  %v552_v31 = vpack.c.bf16 %v538_v25, %v536_v17 }
 0x13d   : > { %v545_v32 = vpack.c.bf16 %v523_v27, %v521_v26  ;;  %v469_v33 = vpop.f32.mrb[8].mxu0  ;;  %v553_v34 = vpack.c.bf16 %v539_v28, %v537_v21  ;;  %v509_v35 = vpop.f32.mrb[8].mxu1  ;;  %1326 = vmatpush3.bf16.msra.mxu0 %v1466_v13 }
 0x13e   : > { %v470_v36 = vadd.f32 %v469_v33, %v1845_v39  ;;  %v471_v37 = vpop.f32.mrb[9].mxu0  ;;  %v511_v38 = vpop.f32.mrb[9].mxu1  ;;  %v510_v8 = vadd.f32 %v509_v35, %v1845_v39  ;;  %1327 = vmatprep.subr.bf16.mxu0 %v1603_v29 }
 0x13f   : > { %v472_v41 = vadd.f32 %v471_v37, %v1847_v40  ;;  %v473_v42 = vpop.f32.mrb[10].mxu0  ;;  %731 = vmatprep.mubr.bf16.mxu1 %v545_v32  ;;  %v513_v43 = vpop.f32.mrb[10].mxu1  ;;  %v512_v6 = vadd.f32 %v511_v38, %v1847_v40 }
 0x140   : > { %v474_v44 = vadd.f32 %v473_v42, %v1845_v39  ;;  %v475_v45 = vpop.f32.mrb[11].mxu0  ;;  %732 = vmatmul.mubr.bf16.gmra.mrb[16].mxu1 %v544_v30  ;;  %v514_v46 = vpop.f32.mrb[11].mxu1  ;;  %v524_v48 = vmax.f32 %v470_v36, 0.0  ;;  %v540_v10 = vmax.f32 %v510_v8, 0.0 }
 0x141   : > { %v476_v47 = vadd.f32 %v475_v45, %v1847_v40  ;;  %v525_v50 = vmax.f32 %v472_v41, 0.0  ;;  %v541_v7 = vmax.f32 %v512_v6, 0.0 }
 0x142   : > { %v526_v49 = vmax.f32 %v474_v44, 0.0  ;;  %v554_v11 = vpack.c.bf16 %v540_v10, %v540_v10 }
 0x143   : > { %v527_v51 = vmax.f32 %v476_v47, 0.0  ;;  %v555_v9 = vpack.c.bf16 %v541_v7, %v541_v7 }
 0x144   : > { %v546_v52 = vpack.c.bf16 %v526_v49, %v524_v48 }
 0x145   : > { %v547_v53 = vpack.c.bf16 %v527_v51, %v525_v50  ;;  %v479_v54 = vpop.f32.mrb[12].mxu0 }
 0x146   : > { %v480_v55 = vadd.f32 %v479_v54, %v1845_v39  ;;  %v481_v56 = vpop.f32.mrb[13].mxu0 }
 0x147   : > { %v482_v57 = vadd.f32 %v481_v56, %v1847_v40  ;;  %v483_v58 = vpop.f32.mrb[14].mxu0  ;;  %739 = vmatprep.mubr.bf16.mxu1 %v547_v53 }
 0x148   : > { %v484_v59 = vadd.f32 %v483_v58, %v1845_v39  ;;  %v485_v60 = vpop.f32.mrb[15].mxu0  ;;  %740 = vmatmul.mubr.bf16.gmra.mrb[20].mxu1 %v546_v52  ;;  %v528_v62 = vmax.f32 %v480_v55, 0.0 }
 0x149   : > { %v486_v61 = vadd.f32 %v485_v60, %v1847_v40  ;;  %v529_v0 = vmax.f32 %v482_v57, 0.0  ;;  %v1467_v40 = vld [vmem:[#allocation5 + $0x38] sm:$0xff]  }
 0x14a   : > { %v530_v63 = vmax.f32 %v484_v59, 0.0  ;;  %1328 = vmatpush3.bf16.msra.mxu0 %v1467_v40 }
 0x14b   : > { %v531_v1 = vmax.f32 %v486_v61, 0.0 }
 0x14c   : > { %v548_v3 = vpack.c.bf16 %v530_v63, %v528_v62 }
 0x14d   : > { %v549_v4 = vpack.c.bf16 %v531_v1, %v529_v0 }
 0x14f   : > { %747 = vmatprep.mubr.bf16.mxu1 %v549_v4 }
 0x150   : > { %748 = vmatmul.mubr.bf16.gmra.mrb[24].mxu1 %v548_v3 }
 0x151   : > { %755 = vmatprep.mubr.bf16.mxu1 %v1859_v5 }
 0x158   : > { %756 = vmatmul.mubr.bf16.gmra.mrb[28].mxu1 %v1857_v2  ;;  %v1888_v2 = vld [vmem:[%s1986_s4] ss:$0 sm:$0xff] }
 0x159   : > { %763 = vmatprep.mubr.bf16.mxu1 %v553_v34 }
 0x160   : > { %764 = vmatmul.mubr.bf16.gmra.mrb[32].mxu1 %v552_v31 }
 0x161   : > { %771 = vmatprep.mubr.bf16.mxu1 %v555_v9 }
 0x168   : > { %772 = vmatmul.mubr.bf16.gmra.mrb[36].mxu1 %v554_v11 }
 0x20b   : > { %v1256_v39 = vpop.f32.mrb[12].mxu1 }
 0x20c   : > { %v1257_v5 = vpop.f32.mrb[13].mxu1 }
 0x20d   : > { %v1258_v14 = vadd.f32 %v1257_v5, %v1256_v39  ;;  %v1259_v15 = vpop.f32.mrb[14].mxu1 }
 0x20e   : > { %v1260_v16 = vpop.f32.mrb[15].mxu1 }
 0x20f   : > { %v726_v17 = vadd.f32 %v1258_v14, %v1888_v2  ;;  %v1261_v18 = vadd.f32 %v1260_v16, %v1259_v15 }
 0x211   : > { %v729_v19 = vadd.f32 %v1261_v18, %v1888_v2  ;;  %v779_v20 = vmax.f32 %v726_v17, 0.0 }
 0x213   : > { %v780_v21 = vmax.f32 %v729_v19, 0.0  ;;  %v1262_v22 = vpop.f32.mrb[16].mxu1 }
 0x214   : > { %v1263_v23 = vpop.f32.mrb[17].mxu1 }
 0x215   : > { %v792_v24 = vpack.c.bf16 %v780_v21, %v779_v20  ;;  %v1264_v25 = vadd.f32 %v1263_v23, %v1262_v22  ;;  %v1265_v26 = vpop.f32.mrb[18].mxu1 }
 0x216   : > { %v1266_v27 = vpop.f32.mrb[19].mxu1 }
 0x217   : > { %v734_v28 = vadd.f32 %v1264_v25, %v1888_v2  ;;  %v1267_v30 = vadd.f32 %v1266_v27, %v1265_v26  ;;  %1330 = vmatmul.mubr.bf16.vlgmr.msra.gmra.mrb[16].mxu0 %v792_v24  ;;  %v1166_v24 = vld [vmem:[%s1988_s6] ss:$0 sm:$0xff] }
 0x218   : > { %1333 = vmatprep.mubr.msk.bf16.mxu0 %vm1604_vm1, %v1603_v29 }
 0x219   : > { %v737_v31 = vadd.f32 %v1267_v30, %v1888_v2  ;;  %v781_v32 = vmax.f32 %v734_v28, 0.0 }
 0x21b   : > { %v782_v33 = vmax.f32 %v737_v31, 0.0  ;;  %v1268_v34 = vpop.f32.mrb[20].mxu1 }
 0x21c   : > { %v1269_v35 = vpop.f32.mrb[21].mxu1 }
 0x21d   : > { %v1270_v36 = vadd.f32 %v1269_v35, %v1268_v34  ;;  %v1271_v37 = vpop.f32.mrb[22].mxu1  ;;  %v793_v38 = vpack.c.bf16 %v782_v33, %v781_v32 }
 0x21e   : > { %v1272_v41 = vpop.f32.mrb[23].mxu1 }
 0x21f   : > { %v742_v42 = vadd.f32 %v1270_v36, %v1888_v2  ;;  %v1273_v43 = vadd.f32 %v1272_v41, %v1271_v37  ;;  %1334 = vmatmul.mubr.bf16.gmra.mrb[20].mxu0 %v793_v38 }
 0x220   : > { %1337 = vmatprep.mubr.msk.bf16.mxu0 %vm1604_vm1, %v1603_v29 }
 0x221   : > { %v745_v44 = vadd.f32 %v1273_v43, %v1888_v2  ;;  %v783_v45 = vmax.f32 %v742_v42, 0.0 }
 0x223   : > { %v784_v46 = vmax.f32 %v745_v44, 0.0  ;;  %v1274_v47 = vpop.f32.mrb[24].mxu1 }
 0x224   : > { %v1275_v48 = vpop.f32.mrb[25].mxu1 }
 0x225   : > { %v1276_v49 = vadd.f32 %v1275_v48, %v1274_v47  ;;  %v1277_v50 = vpop.f32.mrb[26].mxu1  ;;  %v794_v51 = vpack.c.bf16 %v784_v46, %v783_v45 }
 0x226   : > { %v1278_v52 = vpop.f32.mrb[27].mxu1 }
 0x227   : > { %v750_v53 = vadd.f32 %v1276_v49, %v1888_v2  ;;  %v1279_v54 = vadd.f32 %v1278_v52, %v1277_v50  ;;  %1338 = vmatmul.mubr.bf16.gmra.mrb[24].mxu0 %v794_v51 }
 0x228   : > { %1341 = vmatprep.mubr.msk.bf16.mxu0 %vm1604_vm1, %v1603_v29 }
 0x229   : > { %v753_v55 = vadd.f32 %v1279_v54, %v1888_v2  ;;  %v785_v56 = vmax.f32 %v750_v53, 0.0 }
 0x22b   : > { %v786_v57 = vmax.f32 %v753_v55, 0.0  ;;  %v1280_v58 = vpop.f32.mrb[28].mxu1 }
 0x22c   : > { %v1281_v59 = vpop.f32.mrb[29].mxu1 }
 0x22d   : > { %v1282_v60 = vadd.f32 %v1281_v59, %v1280_v58  ;;  %v1283_v61 = vpop.f32.mrb[30].mxu1  ;;  %v795_v62 = vpack.c.bf16 %v786_v57, %v785_v56 }
 0x22e   : > { %v1284_v63 = vpop.f32.mrb[31].mxu1 }
 0x22f   : > { %v758_v0 = vadd.f32 %v1282_v60, %v1888_v2  ;;  %v1285_v1 = vadd.f32 %v1284_v63, %v1283_v61  ;;  %1342 = vmatmul.mubr.bf16.gmra.mrb[28].mxu0 %v795_v62 }
 0x230   : > { %1345 = vmatprep.mubr.msk.bf16.mxu0 %vm1604_vm1, %v1603_v29 }
 0x231   : > { %v761_v3 = vadd.f32 %v1285_v1, %v1888_v2  ;;  %v787_v4 = vmax.f32 %v758_v0, 0.0 }
 0x233   : > { %v788_v6 = vmax.f32 %v761_v3, 0.0  ;;  %v1286_v7 = vpop.f32.mrb[32].mxu1 }
 0x234   : > { %v1287_v8 = vpop.f32.mrb[33].mxu1 }
 0x235   : > { %v1288_v9 = vadd.f32 %v1287_v8, %v1286_v7  ;;  %v1289_v10 = vpop.f32.mrb[34].mxu1  ;;  %v796_v11 = vpack.c.bf16 %v788_v6, %v787_v4 }
 0x236   : > { %v1290_v12 = vpop.f32.mrb[35].mxu1 }
 0x237   : > { %v766_v13 = vadd.f32 %v1288_v9, %v1888_v2  ;;  %v1291_v40 = vadd.f32 %v1290_v12, %v1289_v10  ;;  %1346 = vmatmul.mubr.bf16.gmra.mrb[32].mxu0 %v796_v11 }
 0x238   : > { %1349 = vmatprep.mubr.msk.bf16.mxu0 %vm1604_vm1, %v1603_v29 }
 0x239   : > { %v769_v39 = vadd.f32 %v1291_v40, %v1888_v2  ;;  %v789_v5 = vmax.f32 %v766_v13, 0.0 }
 0x23b   : > { %v790_v14 = vmax.f32 %v769_v39, 0.0  ;;  %v1292_v15 = vpop.f32.mrb[36].mxu1 }
 0x23c   : > { %v1293_v16 = vpop.f32.mrb[37].mxu1 }
 0x23d   : > { %v1294_v17 = vadd.f32 %v1293_v16, %v1292_v15  ;;  %v1295_v18 = vpop.f32.mrb[38].mxu1  ;;  %v797_v19 = vpack.c.bf16 %v790_v14, %v789_v5 }
 0x23e   : > { %v1296_v20 = vpop.f32.mrb[39].mxu1 }
 0x23f   : > { %v774_v21 = vadd.f32 %v1294_v17, %v1888_v2  ;;  %1350 = vmatmul.mubr.bf16.gmra.mrb[36].mxu0 %v797_v19 }
 0x240   : > { %1353 = vmatprep.mubr.msk.bf16.mxu0 %vm1604_vm1, %v1603_v29 }
 0x241   : > { %v791_v22 = vmax.f32 %v774_v21, 0.0 }
 0x243   : > { %v798_v23 = vpack.c.bf16 %v791_v22, %v791_v22 }
 0x247   : > { %1354 = vmatmul.mubr.bf16.gmra.mrb[40].mxu0 %v798_v23 }
 0x2ea   : > { %v904_v25 = vpop.f32.mrb[16].mxu0 }
 0x2eb   : > { %v1331_v26 = vpop.f32.mrb[17].mxu0  ;;  %v905_v28 = vadd.f32 %v1166_v24, %v904_v25 }
 0x2ec   : > { %v907_v27 = vpop.f32.mrb[18].mxu0 }
 0x2ed   : > { %v908_v30 = vadd.f32 %v1166_v24, %v907_v27  ;;  %v1332_v2 = vpop.f32.mrb[19].mxu0 }
 0x2ef   : > { %v1208_v31 = vpack.c.bf16 %v908_v30, %v905_v28 }
 0x2f1   : > { %1209 = vst [vmem:[%s1921_s13] sm:$0xff] %v1208_v31  }
 0x2f2   : > { %v912_v29 = vpop.f32.mrb[20].mxu0 }
 0x2f3   : > { %v1335_v32 = vpop.f32.mrb[21].mxu0  ;;  %v913_v34 = vadd.f32 %v1166_v24, %v912_v29 }
 0x2f4   : > { %v915_v33 = vpop.f32.mrb[22].mxu0 }
 0x2f5   : > { %v916_v35 = vadd.f32 %v1166_v24, %v915_v33  ;;  %v1336_v36 = vpop.f32.mrb[23].mxu0 }
 0x2f7   : > { %v1213_v37 = vpack.c.bf16 %v916_v35, %v913_v34 }
 0x2f9   : > { %1235 = vst [vmem:[%s1921_s13 + $0x8] sm:$0xff] %v1213_v37  }
 0x2fa   : > { %v920_v38 = vpop.f32.mrb[24].mxu0 }
 0x2fb   : > { %v1339_v41 = vpop.f32.mrb[25].mxu0  ;;  %v921_v43 = vadd.f32 %v1166_v24, %v920_v38 }
 0x2fc   : > { %v923_v42 = vpop.f32.mrb[26].mxu0 }
 0x2fd   : > { %v924_v44 = vadd.f32 %v1166_v24, %v923_v42  ;;  %v1340_v45 = vpop.f32.mrb[27].mxu0 }
 0x2ff   : > { %v1218_v46 = vpack.c.bf16 %v924_v44, %v921_v43 }
 0x301   : > { %1236 = vst [vmem:[%s1921_s13 + $0x10] sm:$0xff] %v1218_v46  }
 0x302   : > { %v928_v47 = vpop.f32.mrb[28].mxu0 }
 0x303   : > { %v1343_v48 = vpop.f32.mrb[29].mxu0  ;;  %v929_v50 = vadd.f32 %v1166_v24, %v928_v47 }
 0x304   : > { %v931_v49 = vpop.f32.mrb[30].mxu0 }
 0x305   : > { %v932_v51 = vadd.f32 %v1166_v24, %v931_v49  ;;  %v1344_v52 = vpop.f32.mrb[31].mxu0 }
 0x307   : > { %v1223_v53 = vpack.c.bf16 %v932_v51, %v929_v50 }
 0x309   : > { %1237 = vst [vmem:[%s1921_s13 + $0x18] sm:$0xff] %v1223_v53  }
 0x30a   : > { %v936_v54 = vpop.f32.mrb[32].mxu0 }
 0x30b   : > { %v1347_v55 = vpop.f32.mrb[33].mxu0  ;;  %v937_v57 = vadd.f32 %v1166_v24, %v936_v54 }
 0x30c   : > { %v939_v56 = vpop.f32.mrb[34].mxu0 }
 0x30d   : > { %v940_v58 = vadd.f32 %v1166_v24, %v939_v56  ;;  %v1348_v59 = vpop.f32.mrb[35].mxu0 }
 0x30f   : > { %v1228_v60 = vpack.c.bf16 %v940_v58, %v937_v57 }
 0x311   : > { %1238 = vst [vmem:[%s1921_s13 + $0x20] sm:$0xff] %v1228_v60  }
 0x312   : > { %v944_v61 = vpop.f32.mrb[36].mxu0 }
 0x313   : > { %v1351_v62 = vpop.f32.mrb[37].mxu0  ;;  %v945_v0 = vadd.f32 %v1166_v24, %v944_v61 }
 0x314   : > { %v947_v63 = vpop.f32.mrb[38].mxu0 }
 0x315   : > { %v948_v1 = vadd.f32 %v1166_v24, %v947_v63  ;;  %v1352_v3 = vpop.f32.mrb[39].mxu0 }
 0x317   : > { %v1233_v4 = vpack.c.bf16 %v948_v1, %v945_v0 }
 0x319   : > { %1239 = vst [vmem:[%s1921_s13 + $0x28] sm:$0xff] %v1233_v4  }
 0x31a   : > { %v952_v6 = vpop.f32.mrb[40].mxu0 }
 0x31b   : > { %v953_v7 = vadd.f32 %v1166_v24, %v952_v6  ;;  %v1355_v8 = vpop.f32.mrb[41].mxu0 }
 0x31c   : > { %v955_v9 = vpop.f32.mrb[42].mxu0 }
 0x31d   : > { %v1203_v10 = vpack.c.bf16 %v953_v7, %v953_v7  ;;  %v1356_v11 = vpop.f32.mrb[43].mxu0 }
 0x31f   : > { %1023 = vst [vmem:[%s1921_s13 + $0x30] sm:$0xf] %v1203_v10 }
 0x320   : > { %1537 = shalt.err (!%p1534_p11)
}
 0x321   : > { %s1538_s10 = scalar_lea.hbm %s1936_s23, 832  ;;  %s1542_s19 = scalar_lea.hbm %s1989_s7, 1664 }
 0x322   : > { %p1539_p13 = scmp.ne.s32.totalorder %s1936_s23, %s1538_s10  ;;  %p1543_p6 = scmp.lt.u32.totalorder %s1936_s23, %s1989_s7 }
 0x323   : > { %p1544_p9 = scmp.lt.u32.totalorder %s1542_s19, %s1538_s10  ;;  %p1546_p10 = scmp.lt.u32.totalorder %s1538_s10, %s1936_s23 }
 0x324   : > { %p1540_p0 = pnand %p1539_p13, %p2003_p1 }
 0x325   : > { %p1545_p12 = por %p1544_p9, %p1543_p6 }
 0x326   : > { %p1541_p5 = pneg %p1540_p0 }
 0x327   : > { %p1547_p2 = por %p1546_p10, %p1545_p12 }
 0x329   : > { %p1548_p3 = pnand %p1547_p2, %p1541_p5 }
 0x32b   : > { %1551 = shalt.err (!%p1548_p3)
}
 0x32c   : > { %s1606_s18 = smov 64   ;;  %s1607_s22 = smov 4  }
 0x32d   : > { %1370 = dma.vmem_to_hbm [thread:$0]  (%p2003_p1), %s1931_s20, 832, %s1936_s23, %s1941_s28, %s1606_s18, %s1606_s18, %s1607_s22  }
 0x32e PF: > { %p1387_p4 = scmp.ge.s32.totalorder %s1594_s27, 2  ;;  %s1053_s21 = sand.u32 1, %s1582_s24  }
 0x32f   : > { %p2004_p7 = scmp.ne.s32.totalorder %s1995_s12, 0  ;;  %s1054_s29 = scalar_lea.sflag [#allocation4], %s1053_s21 }
 0x331   : > { %p1380_p8 = pnand %p1387_p4, %p2004_p7 }
 0x333   : > { %1577 = dma.done.wait (!%p1380_p8), %s1054_s29, 832  }
 0x334   : > { %1579 = vsyncadd (!%p1380_p8), %s1054_s29, 4294966464  ;;  %s2005_s8 = sld [smem:[#allocation11_spill]]  ;;  %p19_p11 = scmp.ge.s32.totalorder %s1673_s30, 4  }
 0x335   : > { %s2006_s24 = smov %s1586_s25  ;;  %s2007_s25 = smov %s1590_s26 }
 0x336   : > { %s2009_s27 = smov %s1673_s30  ;;  %21 = sbr.rel (!%p19_p11) target bundleno = 5 (0x5), region = 92 }
 0x33a   : > { %s2008_s26 = smov %s2005_s8 }
 0x33d   :  { %1059 = vsyncpa [#allocation3], 1 }
 0x33e   :  { %1061 = vsyncpa [#allocation3 + $0x1], 1 }
 0x33f   :  { %1062 = vsyncpa [#allocation6], 1 }
 0x340   :  { %1063 = vsyncpa [#allocation4], 1 }
 0x341   :  { %1065 = vsyncpa [#allocation4 + $0x1], 1 }

</bundles_post_ra>
